<compile_context>
chip_gen: v6e
topology: v6e:2x2x1
jax: 0.10.0
libtpu: 0.0.40
codegen_flags: <defaults>
</compile_context>

<pallas_src>
import jax
import jax.numpy as jnp
from jax.experimental import pallas as pl
from jax.experimental.pallas import tpu as pltpu

_LANES = 128
_NEG_BIG = -1e30  # padded-action bias: never the max, exp() underflows to 0


def fc_logsoftmax_kernel(x_ref, w_ref, b_ref, o_ref):
    """Fused linear layer + row-wise log_softmax (one batch tile per grid step).

    x_ref: (TB, D)     f32  -- input-state tile
    w_ref: (D, A_pad)  f32  -- pre-transposed fc weight (padded actions = 0)
    b_ref: (1, A_pad)  f32  -- fc bias (padded actions = -1e30)
    o_ref: (TB, A_pad) f32  -- log_softmax(x @ w + b) ; padded lanes are junk
    """
    x = x_ref[...]
    w = w_ref[...]
    b = b_ref[...]
    # Contraction on the last dim of x / first dim of w: no in-kernel transpose.
    logits = jnp.dot(x, w, preferred_element_type=jnp.float32) + b  # (TB, A_pad)
    # Numerically stable log_softmax along dim=1; padded lanes hold ~-1e30 so
    # they neither win the max nor add to the sum.
    m = jnp.max(logits, axis=1, keepdims=True)
    z = logits - m
    o_ref[...] = z - jnp.log(jnp.sum(jnp.exp(z), axis=1, keepdims=True))


def lstm_policy_forward(state, fc_w, fc_b, *, max_tile_b=256):
    """state (B, D), fc_w (A, D), fc_b (A,) -> log-probs (B, A)."""
    B, D = state.shape
    A, D2 = fc_w.shape
    assert D == D2, "fc weight in_features must match state feature dim"

    # --- layout prep (wrapper side, negligible size) -------------------------
    A_pad = max(_LANES, pl.cdiv(A, _LANES) * _LANES)          # lane-dense output
    w_t = jnp.zeros((D, A_pad), jnp.float32).at[:, :A].set(
        fc_w.astype(jnp.float32).T)                            # pre-transposed
    b_pad = jnp.full((1, A_pad), _NEG_BIG, jnp.float32).at[0, :A].set(
        fc_b.astype(jnp.float32))

    # --- batch tiling: TB multiple of 8, pad B up ----------------------------
    TB = min(max_tile_b, max(8, pl.cdiv(B, 8) * 8))
    B_pad = pl.cdiv(B, TB) * TB
    x = state.astype(jnp.float32)
    if B_pad != B:
        x = jnp.pad(x, ((0, B_pad - B), (0, 0)))

    out = pl.pallas_call(
        fc_logsoftmax_kernel,
        out_shape=jax.ShapeDtypeStruct((B_pad, A_pad), jnp.float32),
        grid_spec=pl.GridSpec(
            grid=(B_pad // TB,),
            in_specs=[
                pl.BlockSpec((TB, D), lambda i: (i, 0)),       # x: tiled over B
                pl.BlockSpec((D, A_pad), lambda i: (0, 0)),    # w: block-invariant
                pl.BlockSpec((1, A_pad), lambda i: (0, 0)),    # b: block-invariant
            ],
            out_specs=pl.BlockSpec((TB, A_pad), lambda i: (i, 0)),
        ),
        compiler_params=pltpu.CompilerParams(
            dimension_semantics=("parallel",)),                # megacore on v7x
    )(x, w_t, b_pad)

    return out[:B, :A]


if __name__ == "__main__":
    # Module hyper-parameters (small, consistent with the PyTorch __init__).
    n_states, n_hidden, n_actions, batch_size = 16, 32, 3, 2
    in_dim = n_hidden * 2 + n_states  # fc input dim = 80

    key = jax.random.PRNGKey(0)
    k_w, k_b, k_x = jax.random.split(key, 3)

    # fc.weight.data.normal_(0, 0.1); fc.bias keeps default Linear init (uniform).
    fc_w = 0.1 * jax.random.normal(k_w, (n_actions, in_dim), dtype=jnp.float32)
    bound = 1.0 / jnp.sqrt(jnp.float32(in_dim))
    fc_b = jax.random.uniform(k_b, (n_actions,), jnp.float32, -bound, bound)

    # Example `state` input to forward(): (batch, n_hidden*2 + n_states).
    state = jax.random.normal(k_x, (batch_size, in_dim), dtype=jnp.float32)

    out = lstm_policy_forward(state, fc_w, fc_b)
    out = jax.block_until_ready(out)

    # Cross-check against plain-JAX reference of the same math.
    ref = jax.nn.log_softmax(state @ fc_w.T + fc_b, axis=1)
    assert out.shape == (batch_size, n_actions)
    assert jnp.allclose(out, ref, atol=1e-5, rtol=1e-5), "mismatch vs reference"

    print("KERNEL_OK")
</pallas_src>

<mosaic_0001>
module attributes {stable_mosaic.version = 11 : i64} {
  func.func @fc_logsoftmax_kernel(%arg0: i32, %arg1: memref<8x80xf32, #tpu.memory_space<vmem>>, %arg2: memref<80x128xf32, #tpu.memory_space<vmem>>, %arg3: memref<1x128xf32, #tpu.memory_space<vmem>>, %arg4: memref<8x128xf32, #tpu.memory_space<vmem>>) attributes {dimension_semantics = [#tpu.dimension_semantics<parallel>], iteration_bounds = array<i64: 1>, scalar_prefetch = 0 : i64, scratch_operands = 0 : i64, tpu.core_type = #tpu.core_type<tc>, window_params = [{transform_indices = @transform_0, window_bounds = array<i64: 8, 80>}, {pipeline_mode = #tpu.pipeline_mode<synchronous>, transform_indices = @transform_1, window_bounds = array<i64: 80, 128>}, {pipeline_mode = #tpu.pipeline_mode<synchronous>, transform_indices = @transform_2, window_bounds = array<i64: 1, 128>}, {transform_indices = @transform_3, window_bounds = array<i64: 8, 128>}]} {
    %c0 = arith.constant 0 : index
    %c0_0 = arith.constant 0 : index
    %0 = vector.load %arg1[%c0, %c0_0] : memref<8x80xf32, #tpu.memory_space<vmem>>, vector<8x80xf32>
    %c0_1 = arith.constant 0 : index
    %c0_2 = arith.constant 0 : index
    %1 = vector.load %arg2[%c0_1, %c0_2] : memref<80x128xf32, #tpu.memory_space<vmem>>, vector<80x128xf32>
    %c0_3 = arith.constant 0 : index
    %c0_4 = arith.constant 0 : index
    %2 = vector.load %arg3[%c0_3, %c0_4] : memref<1x128xf32, #tpu.memory_space<vmem>>, vector<1x128xf32>
    %cst = arith.constant dense<0.000000e+00> : vector<8x128xf32>
    %3 = tpu.matmul %0, %1, %cst {dimension_numbers = #tpu.dot_dimension_numbers<[1], [0], [0], [1], [0, 0, 1, 1], [], []>} : vector<8x80xf32>, vector<80x128xf32>, vector<8x128xf32> -> vector<8x128xf32>
    %4 = vector.broadcast %2 : vector<1x128xf32> to vector<8x128xf32>
    %5 = arith.addf %3, %4 : vector<8x128xf32>
    %cst_5 = arith.constant dense<0xFF800000> : vector<8xf32>
    %6 = vector.multi_reduction <maximumf>, %5, %cst_5 [1] : vector<8x128xf32> to vector<8xf32>
    %7 = vector.shape_cast %6 : vector<8xf32> to vector<8x1xf32>
    %8 = vector.broadcast %7 : vector<8x1xf32> to vector<8x128xf32>
    %9 = arith.subf %5, %8 : vector<8x128xf32>
    %10 = math.exp %9 : vector<8x128xf32>
    %cst_6 = arith.constant dense<0.000000e+00> : vector<8xf32>
    %11 = vector.multi_reduction <add>, %10, %cst_6 [1] : vector<8x128xf32> to vector<8xf32>
    %12 = vector.shape_cast %11 : vector<8xf32> to vector<8x1xf32>
    %13 = math.log %12 : vector<8x1xf32>
    %14 = vector.broadcast %13 : vector<8x1xf32> to vector<8x128xf32>
    %15 = arith.subf %9, %14 : vector<8x128xf32>
    %c0_7 = arith.constant 0 : index
    %c0_8 = arith.constant 0 : index
    %16 = vector.load %arg4[%c0_7, %c0_8] : memref<8x128xf32, #tpu.memory_space<vmem>>, vector<8x128xf32>
    tpu.vector_store %arg4[%c0_7, %c0_8], %15 {strides = array<i32>} : memref<8x128xf32, #tpu.memory_space<vmem>>, vector<8x128xf32>,
    return
  }
  func.func @transform_0(%arg0: i32) -> (i32, i32) {
    %c0_i32 = arith.constant 0 : i32
    %c0_i32_0 = arith.constant 0 : i32
    return %arg0, %c0_i32 : i32, i32
  }
  func.func @transform_1(%arg0: i32) -> (i32, i32) {
    %c0_i32 = arith.constant 0 : i32
    %c0_i32_0 = arith.constant 0 : i32
    %c0_i32_1 = arith.constant 0 : i32
    return %c0_i32, %c0_i32_0 : i32, i32
  }
  func.func @transform_2(%arg0: i32) -> (i32, i32) {
    %c0_i32 = arith.constant 0 : i32
    %c0_i32_0 = arith.constant 0 : i32
    %c0_i32_1 = arith.constant 0 : i32
    return %c0_i32, %c0_i32_0 : i32, i32
  }
  func.func @transform_3(%arg0: i32) -> (i32, i32) {
    %c0_i32 = arith.constant 0 : i32
    %c0_i32_0 = arith.constant 0 : i32
    return %arg0, %c0_i32 : i32, i32
  }
}

</mosaic_0001>

<bundles_post_ra>
// kernel: tpu_custom_call.1
= control target key start
LH: loop header
LB: loop body
LE: loop exit
PB: predicated region body
PF: predicated region fallthrough
CT: control target
= control target key end

     0   :  { %8 = vsyncpa [#allocation3], 0  ;;  %s312_s0 = inlined_call_operand.hbm [shape: f32[8,80], index: 0, kind: input, shape index: {}]   ;;  %s313_s1 = inlined_call_operand.hbm [shape: f32[80,128], index: 1, kind: input, shape index: {}]   ;;  %s314_s2 = inlined_call_operand.vmem [shape: f32[1,128], index: 2, kind: input, shape index: {}]   ;;  %s315_s3 = inlined_call_operand.hbm [shape: f32[8,128], index: 3, kind: output, shape index: {}]  }
   0x1   :  { %9 = vsyncpa [#allocation6], 0 }
   0x2   :  { %10 = vsyncpa [#allocation4], 0  ;;  %s273_s12 = smov [#allocation2]   ;;  %s274_s14 = smov [#allocation5]  }
   0x3   :  { %s17_s13 = sshll.u32 %s273_s12, 4  ;;  %s26_s15 = sshll.u32 %s274_s14, 4  ;;  %s18_s13 = int_to_ptr.vmem [resolvable:$true] %s17_s13  ;;  %s27_s15 = int_to_ptr.vmem [resolvable:$true] %s26_s15 }
   0x4   :  { %s215_s16 = scalar_lea.vmem %s18_s13, 128  ;;  %p220_p1 = scmp.lt.s32.totalorder %s18_s13, %s18_s13 }
   0x5   :  { %p216_p0 = scmp.ne.s32.totalorder %s18_s13, %s215_s16  ;;  %p221_p2 = scmp.lt.s32.totalorder %s215_s16, %s215_s16 }
   0x7   :  { %p222_p3 = por %p221_p2, %p220_p1 }
   0x9   :  { %p223_p4 = pnand %p222_p3, %p216_p0 }
   0xb   :  { %226 = shalt.err (!%p223_p4)
}
   0xc   :  { %20 = dma.hbm_to_vmem [thread:$0]  %s312_s0, 128, %s18_s13, [#allocation3]  }
   0xd   :  { %s235_s19 = scalar_lea.vmem %s27_s15, 1280  ;;  %p240_p6 = scmp.lt.s32.totalorder %s27_s15, %s27_s15 }
   0xe   :  { %p236_p5 = scmp.ne.s32.totalorder %s27_s15, %s235_s19  ;;  %p241_p7 = scmp.lt.s32.totalorder %s235_s19, %s235_s19 }
  0x10   :  { %p242_p8 = por %p241_p7, %p240_p6 }
  0x12   :  { %p243_p9 = pnand %p242_p8, %p236_p5 }
  0x14   :  { %246 = shalt.err (!%p243_p9)
}
  0x15   :  { %s275_s20 = smov 128   ;;  %s276_s21 = smov 8  }
  0x16   :  { %32 = dma.hbm_to_vmem [thread:$0]  %s313_s1, 1280, %s27_s15, [#allocation6], %s275_s20, %s275_s20, %s276_s21  }
  0x17   :  { %267 = dma.done.wait [#allocation3], 128  }
  0x18   :  { %268 = vsyncadd [#allocation3], 4294967168 }
  0x19   :  { %269 = dma.done.wait [#allocation6], 1280  }
  0x1a   :  { %270 = vsyncadd [#allocation6], 4294966016  ;;  %v277_v0 = vmov 0.0   ;;  %vm278_vm0 = vmmov 0   ;;  %v51_v1 = vld [vmem:[#allocation5 + $0x48] sm:$0xff]  ;;  %v50_v2 = vld [vmem:[#allocation5 + $0x40] sm:$0xff] }
  0x1b   :  { %173 = vmatprep.subr.mxu0 %v277_v0  ;;  %193 = vmatprep.mubr.msk.f32.mxu0 %vm278_vm0, %v277_v0  ;;  %v49_v3 = vld [vmem:[#allocation5 + $0x38] sm:$0xff]  ;;  %v48_v4 = vld [vmem:[#allocation5 + $0x30] sm:$0xff]  ;;  %v47_v5 = vld [vmem:[#allocation5 + $0x28] sm:$0xff]  ;;  %vm59_vm1 = vcmask 654336   ;;  %s279_s24 = smov [#allocation7]  }
  0x1c   :  { %174 = vmatpush3.msra.mxu0 %v51_v1  ;;  %v46_v6 = vld [vmem:[#allocation5 + $0x20] sm:$0xff]  ;;  %v45_v7 = vld [vmem:[#allocation5 + $0x18] sm:$0xff]  ;;  %v44_v8 = vld [vmem:[#allocation5 + $0x10] sm:$0xff]  ;;  %s150_s25 = sshll.u32 %s279_s24, 4  ;;  %s151_s25 = int_to_ptr.vmem [resolvable:$true] %s150_s25 }
  0x1d   :  { %175 = vmatprep.subr.mxu0 %v277_v0  ;;  %v43_v9 = vld [vmem:[#allocation5 + $0x8] sm:$0xff]  ;;  %v42_v10 = vld [vmem:[#allocation5] sm:$0xff]  ;;  %v41_v11 = vld [vmem:[#allocation2] sm:$0xff]  ;;  %p252_p11 = scmp.lt.s32.totalorder %s151_s25, %s151_s25 }
  0x1e   :  { %176 = vmatpush3.msra.mxu0 %v50_v2  ;;  %v160_v12 = vld [vmem:[%s314_s2] ss:$0 sm:$0xff]  ;;  %s247_s2 = scalar_lea.vmem %s151_s25, 128 }
  0x1f   :  { %177 = vmatprep.subr.mxu0 %v277_v0  ;;  %p248_p10 = scmp.ne.s32.totalorder %s151_s25, %s247_s2  ;;  %p253_p12 = scmp.lt.s32.totalorder %s247_s2, %s247_s2 }
  0x20   :  { %178 = vmatpush3.msra.mxu0 %v49_v3 }
  0x21   :  { %179 = vmatprep.subr.mxu0 %v277_v0  ;;  %p254_p13 = por %p253_p12, %p252_p11 }
  0x22   :  { %180 = vmatpush3.msra.mxu0 %v48_v4 }
  0x23   :  { %181 = vmatprep.subr.mxu0 %v277_v0  ;;  %p255_p0 = pnand %p254_p13, %p248_p10 }
  0x24   :  { %182 = vmatpush3.msra.mxu0 %v47_v5 }
  0x25   :  { %183 = vmatprep.subr.mxu0 %v277_v0 }
  0x26   :  { %184 = vmatpush3.msra.mxu0 %v46_v6 }
  0x27   :  { %185 = vmatprep.subr.mxu0 %v277_v0 }
  0x28   :  { %186 = vmatpush3.msra.mxu0 %v45_v7 }
  0x29   :  { %187 = vmatprep.subr.mxu0 %v277_v0 }
  0x2a   :  { %188 = vmatpush3.msra.mxu0 %v44_v8 }
  0x2b   :  { %189 = vmatprep.subr.mxu0 %v277_v0 }
  0x2c   :  { %190 = vmatpush3.msra.mxu0 %v43_v9 }
  0x2d   :  { %191 = vmatprep.subr.mxu0 %v277_v0 }
  0x2e   :  { %192 = vmatpush3.msra.mxu0 %v42_v10 }
  0x2f   :  { %194 = vmatmul.mubr.msk.f32.vlgmr.msra.gmra.mxu0 %vm59_vm1, %v41_v11 }
  0xef   :  { %v129_v13 = vpop.f32.mrf.mxu0 }
  0xf0   :  { %v130_v14 = vadd.f32 %v160_v12, %v129_v13 }
  0xf1   :  { %v195_v15 = vpop.f32.mrf.mxu0 }
  0xf2   :  { %133 = vmax.xlane.f32.xlu0 %v130_v14 }
 0x17b   :  { %v134_v16 = vpop.xlane.xlu0 %133 }
 0x17c   :  { %v135_v17 = vsub.f32 %v130_v14, %v134_v16 }
 0x17e   :  { %v136_v18 = vmul.f32 1.442695, %v135_v17 }
 0x180   :  { %203 = vpow2.f32 %v136_v18 }
 0x18d   :  { %v204_v19 = vpop.eup %203 }
 0x18e   :  { %138 = vadd.xlane.f32.xlu0 %v204_v19 }
 0x217   :  { %v139_v20 = vpop.xlane.xlu0 %138 }
 0x218   :  { %205 = vlog2.f32 %v139_v20 }
 0x225   :  { %v206_v21 = vpop.eup %205 }
 0x226   :  { %v141_v22 = vmul.f32 0.6931472, %v206_v21 }
 0x228   :  { %v142_v23 = vsub.f32 %v135_v17, %v141_v22 }
 0x22a   :  { %143 = vst [vmem:[#allocation7] sm:$0xff] %v142_v23 }
 0x22b   :  { %258 = shalt.err (!%p255_p0)
}
 0x22c   :  { %153 = dma.vmem_to_hbm [thread:$0]  %s151_s25, 128, %s315_s3, [#allocation4]  }
 0x22d   :  { %271 = dma.done.wait [#allocation4], 128  }
 0x22e   :  { %272 = vsyncadd [#allocation4], 4294967168 }
 0x22f   :  { %157 = vsyncpa [#allocation3], 1 }
 0x230   :  { %158 = vsyncpa [#allocation6], 1 }
 0x231   :  { %159 = vsyncpa [#allocation4], 1 }

</bundles_post_ra>
